<compile_context>
chip_gen: v5e
topology: v5e:2x2
jax: 0.10.0
libtpu: 0.0.40
codegen_flags: <defaults>
</compile_context>

<pallas_src>
import jax
import jax.numpy as jnp
from jax import lax
from jax.experimental import pallas as pl
from jax.experimental.pallas import tpu as pltpu


def _round_up(a, m):
    return (a + m - 1) // m * m


# ---------------------------------------------------------------------------
# Kernel A: segment means (one-pass, MXU) -> linear2 (ReLU) -> @ W1b  == zW
# Grid over row tiles is a reduction axis ("arbitrary"); acc lives in scratch.
# ---------------------------------------------------------------------------
def seg_feature_kernel(x_ref,        # VMEM [T, C_pad]  f32 row tile
                       starts_ref,   # VMEM [1, B_pad]  i32 segment starts
                       ends_ref,     # VMEM [1, B_pad]  i32 segment ends
                       inv_ref,      # VMEM [1, B_pad]  f32 1/count (0 if empty)
                       w2_ref,       # VMEM [C_pad, C_pad] f32 (linear2 weight)
                       b2_ref,       # VMEM [1, C_pad]  f32 (linear2 bias)
                       w1b_ref,      # VMEM [C_pad, C_pad] f32 (linear1 mean-half, BN folded)
                       zw_ref,       # VMEM [B_pad, C_pad] f32 out
                       acc_ref):     # VMEM [B_pad, C_pad] f32 scratch (segment means)
    i = pl.program_id(0)
    tile_rows = x_ref.shape[0]

    @pl.when(i == 0)
    def _():
        acc_ref[...] = jnp.zeros_like(acc_ref)

    row0 = i * tile_rows
    rows = row0 + lax.broadcasted_iota(jnp.int32, (tile_rows, 1), 0)       # [T, 1]
    in_seg = (rows >= starts_ref[...]) & (rows < ends_ref[...])            # [T, B_pad]
    onehot_w = jnp.where(in_seg, inv_ref[...], 0.0)                        # weighted one-hot
    # segment-mean accumulation as a single MXU contraction over the row dim
    acc_ref[...] += lax.dot_general(
        onehot_w, x_ref[...],
        dimension_numbers=(((0,), (0,)), ((), ())),
        preferred_element_type=jnp.float32)                                # [B_pad, C_pad]

    @pl.when(i == pl.num_programs(0) - 1)
    def _():
        means = acc_ref[...]                                               # [B_pad, C_pad]
        h = jnp.dot(means, w2_ref[...],
                    preferred_element_type=jnp.float32) + b2_ref[...]
        h = jnp.maximum(h, 0.0)                                            # linear2 + ReLU
        zw_ref[...] = jnp.dot(h, w1b_ref[...],
                              preferred_element_type=jnp.float32)          # pre-applied W1b


# ---------------------------------------------------------------------------
# Kernel B: per-row output.  out = ReLU(x @ W1a_bf16 + zW[seg(row)] + bias)
# Grid over row tiles is fully independent ("parallel").
# ---------------------------------------------------------------------------
def transition_up_kernel(x_ref,       # VMEM [T, C_pad]  f32 row tile
                         starts_ref,  # VMEM [1, B_pad]  i32
                         ends_ref,    # VMEM [1, B_pad]  i32
                         zw_ref,      # VMEM [B_pad, C_pad] f32 (resident)
                         w1a_ref,     # VMEM [C_pad, C_pad] bf16 (resident, BN folded)
                         bias_ref,    # VMEM [1, C_pad]  f32 fused bias (BN folded)
                         out_ref):    # VMEM [T, C_pad]  f32
    i = pl.program_id(0)
    tile_rows = x_ref.shape[0]
    row0 = i * tile_rows
    rows = row0 + lax.broadcasted_iota(jnp.int32, (tile_rows, 1), 0)       # [T, 1]
    onehot = ((rows >= starts_ref[...]) &
              (rows < ends_ref[...])).astype(jnp.float32)                  # [T, B_pad]
    # exact "gather" of the per-segment feature (already @ W1b) via tiny matmul
    r = jnp.dot(onehot, zw_ref[...], preferred_element_type=jnp.float32)   # [T, C_pad]
    # x half of linear1 in bf16 on the MXU (f32 accumulation)
    xw = jnp.dot(x_ref[...].astype(jnp.bfloat16), w1a_ref[...],
                 preferred_element_type=jnp.float32)                       # [T, C_pad]
    out_ref[...] = jnp.maximum(xw + r + bias_ref[...], 0.0)


def transition_up(x, o, params, *, max_tile_rows=512):
    """x: [N, C] f32, o: [B] int32 cumulative offsets (contract: o[-1] == N)."""
    N, C = x.shape
    B = int(o.shape[0])
    eps = 1e-5
    f32 = jnp.float32

    C_pad = _round_up(C, 128)
    B_pad = _round_up(max(B, 1), 128)
    tile = min(max_tile_rows, _round_up(N, 8))
    N_pad = _round_up(N, tile)
    num_tiles = N_pad // tile

    w1, b1 = params["w1"].astype(f32), params["b1"].astype(f32)   # [2C, C], [C]
    w2, b2 = params["w2"].astype(f32), params["b2"].astype(f32)   # [C, C], [C]
    gamma, beta = params["bn_gamma"], params["bn_beta"]
    rmean, rvar = params["bn_mean"], params["bn_var"]

    # Fold BatchNorm1d (eval mode) into linear1 weights + a single bias.
    scale = gamma / jnp.sqrt(rvar + eps)
    bias_fused = b1 * scale + beta - rmean * scale

    w1a = w1[:C, :] * scale[None, :]     # multiplies x
    w1b = w1[C:, :] * scale[None, :]     # multiplies the per-segment feature

    # Channel/row padding for lane-dense (128) layout and MXU alignment.
    xp = jnp.zeros((N_pad, C_pad), f32).at[:N, :C].set(x.astype(f32))
    w2p = jnp.zeros((C_pad, C_pad), f32).at[:C, :C].set(w2)
    b2p = jnp.zeros((1, C_pad), f32).at[0, :C].set(b2)
    w1ap = jnp.zeros((C_pad, C_pad), f32).at[:C, :C].set(w1a)
    w1bp = jnp.zeros((C_pad, C_pad), f32).at[:C, :C].set(w1b)
    biasp = jnp.zeros((1, C_pad), f32).at[0, :C].set(bias_fused)

    # Segment boundary vectors (padded segments have ends=0 -> always empty).
    o32 = o.astype(jnp.int32)
    starts = jnp.concatenate([jnp.zeros((1,), jnp.int32), o32[:-1]])
    ends = o32
    cnt = (ends - starts).astype(f32)
    inv = jnp.where(cnt > 0, 1.0 / jnp.maximum(cnt, 1.0), 0.0)   # empty-segment guard

    startsp = jnp.zeros((1, B_pad), jnp.int32).at[0, :B].set(starts)
    endsp = jnp.zeros((1, B_pad), jnp.int32).at[0, :B].set(ends)
    invp = jnp.zeros((1, B_pad), f32).at[0, :B].set(inv)

    def const_spec(shape):
        return pl.BlockSpec(shape, lambda i: (0, 0))

    # --- pass 1: per-segment feature zW = ReLU(means @ W2 + b2) @ W1b -------
    zw = pl.pallas_call(
        seg_feature_kernel,
        out_shape=jax.ShapeDtypeStruct((B_pad, C_pad), f32),
        grid=(num_tiles,),
        in_specs=[
            pl.BlockSpec((tile, C_pad), lambda i: (i, 0)),   # x row tiles
            const_spec((1, B_pad)),                          # starts
            const_spec((1, B_pad)),                          # ends
            const_spec((1, B_pad)),                          # 1/cnt
            const_spec((C_pad, C_pad)),                      # W2
            const_spec((1, C_pad)),                          # b2
            const_spec((C_pad, C_pad)),                      # W1b (BN folded)
        ],
        out_specs=const_spec((B_pad, C_pad)),
        scratch_shapes=[pltpu.VMEM((B_pad, C_pad), f32)],
        compiler_params=pltpu.CompilerParams(
            dimension_semantics=("arbitrary",),              # reduction over row tiles
            vmem_limit_bytes=32 * 1024 * 1024),
    )(xp, startsp, endsp, invp, w2p, b2p, w1bp)

    # --- pass 2: per-row output ---------------------------------------------
    out = pl.pallas_call(
        transition_up_kernel,
        out_shape=jax.ShapeDtypeStruct((N_pad, C_pad), f32),
        grid=(num_tiles,),
        in_specs=[
            pl.BlockSpec((tile, C_pad), lambda i: (i, 0)),   # x row tiles
            const_spec((1, B_pad)),                          # starts
            const_spec((1, B_pad)),                          # ends
            const_spec((B_pad, C_pad)),                      # zW (resident)
            const_spec((C_pad, C_pad)),                      # W1a bf16 (resident)
            const_spec((1, C_pad)),                          # fused bias
        ],
        out_specs=pl.BlockSpec((tile, C_pad), lambda i: (i, 0)),
        compiler_params=pltpu.CompilerParams(
            dimension_semantics=("parallel",),               # independent row tiles
            vmem_limit_bytes=32 * 1024 * 1024),
    )(xp, startsp, endsp, zw, w1ap.astype(jnp.bfloat16), biasp)

    return out[:N, :C]


def transition_up_reference(x, o, params):
    """Pure-JAX (f32) reference mirroring the PyTorch forward (pxo2=None branch)."""
    eps = 1e-5
    w1, b1 = params["w1"], params["b1"]
    w2, b2 = params["w2"], params["b2"]
    scale = params["bn_gamma"] / jnp.sqrt(params["bn_var"] + eps)
    shift = params["bn_beta"] - params["bn_mean"] * scale

    outs = []
    start = 0
    for end in list(map(int, o)):
        x_b = x[start:end, :]
        cnt = end - start
        mean = jnp.sum(x_b, axis=0, keepdims=True) / cnt
        h = jnp.maximum(mean @ w2 + b2, 0.0)
        cat = jnp.concatenate([x_b, jnp.tile(h, (cnt, 1))], axis=1)
        outs.append(cat)
        start = end
    cat = jnp.concatenate(outs, axis=0)
    y = cat @ w1 + b1
    y = y * scale + shift
    return jnp.maximum(y, 0.0)


def make_params(key, in_planes):
    C = in_planes
    ks = jax.random.split(key, 6)
    # weights stored as [C_in, C_out]
    return {
        "w1": jax.random.normal(ks[0], (2 * C, C), jnp.float32) * 0.05,
        "b1": jax.random.normal(ks[1], (C,), jnp.float32) * 0.01,
        "w2": jax.random.normal(ks[2], (C, C), jnp.float32) * 0.05,
        "b2": jax.random.normal(ks[3], (C,), jnp.float32) * 0.01,
        "bn_gamma": 1.0 + 0.1 * jax.random.normal(ks[4], (C,), jnp.float32),
        "bn_beta": 0.1 * jax.random.normal(ks[5], (C,), jnp.float32),
        "bn_mean": jnp.zeros((C,), jnp.float32),
        "bn_var": jnp.ones((C,), jnp.float32),
    }


if __name__ == "__main__":
    key = jax.random.PRNGKey(0)
    in_planes = 32          # channel count C
    N = 16                  # total number of points across the batch
    o = jnp.array([8, 16], dtype=jnp.int32)   # two segments: rows [0:8) and [8:16)

    kx, kp = jax.random.split(key)
    x = jax.random.normal(kx, (N, in_planes), jnp.float32)
    params = make_params(kp, in_planes)

    out = transition_up(x, o, params)
    out = jax.block_until_ready(out)

    ref = transition_up_reference(x, o, params)
    assert out.shape == (N, in_planes)
    max_err = float(jnp.max(jnp.abs(out - ref)))
    # bf16 MXU inputs for x @ W1a -> allow a small numerical tolerance
    assert jnp.allclose(out, ref, atol=2e-2, rtol=2e-2), (
        f"mismatch vs reference, max abs err {max_err}")

    print("KERNEL_OK")
</pallas_src>

<mosaic_0001>
module attributes {stable_mosaic.version = 11 : i64} {
  func.func @seg_feature_kernel(%arg0: i32, %arg1: memref<16x128xf32, #tpu.memory_space<vmem>>, %arg2: memref<1x128xi32, #tpu.memory_space<vmem>>, %arg3: memref<1x128xi32, #tpu.memory_space<vmem>>, %arg4: memref<1x128xf32, #tpu.memory_space<vmem>>, %arg5: memref<128x128xf32, #tpu.memory_space<vmem>>, %arg6: memref<1x128xf32, #tpu.memory_space<vmem>>, %arg7: memref<128x128xf32, #tpu.memory_space<vmem>>, %arg8: memref<128x128xf32, #tpu.memory_space<vmem>>, %arg9: memref<128x128xf32, #tpu.memory_space<vmem>>) attributes {dimension_semantics = [#tpu.dimension_semantics<arbitrary>], iteration_bounds = array<i64: 1>, scalar_prefetch = 0 : i64, scratch_operands = 1 : i64, tpu.core_type = #tpu.core_type<tc>, window_params = [{transform_indices = @transform_0, window_bounds = array<i64: 16, 128>}, {pipeline_mode = #tpu.pipeline_mode<synchronous>, transform_indices = @transform_1, window_bounds = array<i64: 1, 128>}, {pipeline_mode = #tpu.pipeline_mode<synchronous>, transform_indices = @transform_2, window_bounds = array<i64: 1, 128>}, {pipeline_mode = #tpu.pipeline_mode<synchronous>, transform_indices = @transform_3, window_bounds = array<i64: 1, 128>}, {pipeline_mode = #tpu.pipeline_mode<synchronous>, transform_indices = @transform_4, window_bounds = array<i64: 128, 128>}, {pipeline_mode = #tpu.pipeline_mode<synchronous>, transform_indices = @transform_5, window_bounds = array<i64: 1, 128>}, {pipeline_mode = #tpu.pipeline_mode<synchronous>, transform_indices = @transform_6, window_bounds = array<i64: 128, 128>}, {pipeline_mode = #tpu.pipeline_mode<synchronous>, transform_indices = @transform_7, window_bounds = array<i64: 128, 128>}]} {
    %c0_i32 = arith.constant 0 : i32
    %0 = arith.cmpi eq, %arg0, %c0_i32 : i32
    %1 = arith.extui %0 : i1 to i32
    %c0_i32_0 = arith.constant 0 : i32
    %2 = arith.cmpi ne, %1, %c0_i32_0 : i32
    scf.if %2 {
      %cst_15 = arith.constant 0.000000e+00 : f32
      %29 = vector.broadcast %cst_15 : f32 to vector<128x128xf32>
      %c0_16 = arith.constant 0 : index
      %c0_17 = arith.constant 0 : index
      %30 = vector.load %arg9[%c0_16, %c0_17] : memref<128x128xf32, #tpu.memory_space<vmem>>, vector<128x128xf32>
      tpu.vector_store %arg9[%c0_16, %c0_17], %29 {strides = array<i32>} : memref<128x128xf32, #tpu.memory_space<vmem>>, vector<128x128xf32>,
    } else {
    }
    %c16_i32 = arith.constant 16 : i32
    %3 = arith.muli %arg0, %c16_i32 : i32
    %4 = tpu.iota {dimensions = array<i32: 0>} : vector<16x1xi32>
    %5 = vector.broadcast %3 : i32 to vector<16x1xi32>
    %6 = arith.addi %5, %4 : vector<16x1xi32>
    %c0 = arith.constant 0 : index
    %c0_1 = arith.constant 0 : index
    %7 = vector.load %arg2[%c0, %c0_1] : memref<1x128xi32, #tpu.memory_space<vmem>>, vector<1x128xi32>
    %8 = vector.broadcast %6 : vector<16x1xi32> to vector<16x128xi32>
    %9 = vector.broadcast %7 : vector<1x128xi32> to vector<16x128xi32>
    %10 = arith.cmpi sge, %8, %9 : vector<16x128xi32>
    %c0_2 = arith.constant 0 : index
    %c0_3 = arith.constant 0 : index
    %11 = vector.load %arg3[%c0_2, %c0_3] : memref<1x128xi32, #tpu.memory_space<vmem>>, vector<1x128xi32>
    %12 = vector.broadcast %6 : vector<16x1xi32> to vector<16x128xi32>
    %13 = vector.broadcast %11 : vector<1x128xi32> to vector<16x128xi32>
    %14 = arith.cmpi slt, %12, %13 : vector<16x128xi32>
    %15 = arith.andi %10, %14 : vector<16x128xi1>
    %c0_4 = arith.constant 0 : index
    %c0_5 = arith.constant 0 : index
    %16 = vector.load %arg4[%c0_4, %c0_5] : memref<1x128xf32, #tpu.memory_space<vmem>>, vector<1x128xf32>
    %cst = arith.constant 0.000000e+00 : f32
    %17 = vector.shape_cast %16 : vector<1x128xf32> to vector<1x128xf32>
    %18 = vector.broadcast %17 : vector<1x128xf32> to vector<16x128xf32>
    %19 = vector.broadcast %cst : f32 to vector<16x128xf32>
    %20 = arith.select %15, %18, %19 : vector<16x128xi1>, vector<16x128xf32>
    %c0_6 = arith.constant 0 : index
    %c0_7 = arith.constant 0 : index
    %21 = vector.load %arg9[%c0_6, %c0_7] : memref<128x128xf32, #tpu.memory_space<vmem>>, vector<128x128xf32>
    %c0_8 = arith.constant 0 : index
    %c0_9 = arith.constant 0 : index
    %22 = vector.load %arg1[%c0_8, %c0_9] : memref<16x128xf32, #tpu.memory_space<vmem>>, vector<16x128xf32>
    %cst_10 = arith.constant dense<0.000000e+00> : vector<128x128xf32>
    %23 = tpu.matmul %20, %22, %cst_10 {dimension_numbers = #tpu.dot_dimension_numbers<[0], [0], [1], [1], [0, 1, 1, 1], [], []>} : vector<16x128xf32>, vector<16x128xf32>, vector<128x128xf32> -> vector<128x128xf32>
    %24 = arith.addf %21, %23 : vector<128x128xf32>
    %c0_11 = arith.constant 0 : index
    %c0_12 = arith.constant 0 : index
    %25 = vector.load %arg9[%c0_11, %c0_12] : memref<128x128xf32, #tpu.memory_space<vmem>>, vector<128x128xf32>
    tpu.vector_store %arg9[%c0_11, %c0_12], %24 {strides = array<i32>} : memref<128x128xf32, #tpu.memory_space<vmem>>, vector<128x128xf32>,
    %c0_i32_13 = arith.constant 0 : i32
    %26 = arith.cmpi eq, %arg0, %c0_i32_13 : i32
    %27 = arith.extui %26 : i1 to i32
    %c0_i32_14 = arith.constant 0 : i32
    %28 = arith.cmpi ne, %27, %c0_i32_14 : i32
    scf.if %28 {
      %c0_15 = arith.constant 0 : index
      %c0_16 = arith.constant 0 : index
      %29 = vector.load %arg9[%c0_15, %c0_16] : memref<128x128xf32, #tpu.memory_space<vmem>>, vector<128x128xf32>
      %c0_17 = arith.constant 0 : index
      %c0_18 = arith.constant 0 : index
      %30 = vector.load %arg5[%c0_17, %c0_18] : memref<128x128xf32, #tpu.memory_space<vmem>>, vector<128x128xf32>
      %cst_19 = arith.constant dense<0.000000e+00> : vector<128x128xf32>
      %31 = tpu.matmul %29, %30, %cst_19 {dimension_numbers = #tpu.dot_dimension_numbers<[1], [0], [0], [1], [0, 0, 1, 1], [], []>} : vector<128x128xf32>, vector<128x128xf32>, vector<128x128xf32> -> vector<128x128xf32>
      %c0_20 = arith.constant 0 : index
      %c0_21 = arith.constant 0 : index
      %32 = vector.load %arg6[%c0_20, %c0_21] : memref<1x128xf32, #tpu.memory_space<vmem>>, vector<1x128xf32>
      %33 = vector.broadcast %32 : vector<1x128xf32> to vector<128x128xf32>
      %34 = arith.addf %31, %33 : vector<128x128xf32>
      %cst_22 = arith.constant 0.000000e+00 : f32
      %35 = vector.broadcast %cst_22 : f32 to vector<128x128xf32>
      %36 = arith.maximumf %34, %35 : vector<128x128xf32>
      %c0_23 = arith.constant 0 : index
      %c0_24 = arith.constant 0 : index
      %37 = vector.load %arg7[%c0_23, %c0_24] : memref<128x128xf32, #tpu.memory_space<vmem>>, vector<128x128xf32>
      %cst_25 = arith.constant dense<0.000000e+00> : vector<128x128xf32>
      %38 = tpu.matmul %36, %37, %cst_25 {dimension_numbers = #tpu.dot_dimension_numbers<[1], [0], [0], [1], [0, 0, 1, 1], [], []>} : vector<128x128xf32>, vector<128x128xf32>, vector<128x128xf32> -> vector<128x128xf32>
      %c0_26 = arith.constant 0 : index
      %c0_27 = arith.constant 0 : index
      %39 = vector.load %arg8[%c0_26, %c0_27] : memref<128x128xf32, #tpu.memory_space<vmem>>, vector<128x128xf32>
      tpu.vector_store %arg8[%c0_26, %c0_27], %38 {strides = array<i32>} : memref<128x128xf32, #tpu.memory_space<vmem>>, vector<128x128xf32>,
    } else {
    }
    return
  }
  func.func @transform_0(%arg0: i32) -> (i32, i32) {
    %c0_i32 = arith.constant 0 : i32
    %c0_i32_0 = arith.constant 0 : i32
    return %arg0, %c0_i32 : i32, i32
  }
  func.func @transform_1(%arg0: i32) -> (i32, i32) {
    %c0_i32 = arith.constant 0 : i32
    %c0_i32_0 = arith.constant 0 : i32
    %c0_i32_1 = arith.constant 0 : i32
    return %c0_i32, %c0_i32_0 : i32, i32
  }
  func.func @transform_2(%arg0: i32) -> (i32, i32) {
    %c0_i32 = arith.constant 0 : i32
    %c0_i32_0 = arith.constant 0 : i32
    %c0_i32_1 = arith.constant 0 : i32
    return %c0_i32, %c0_i32_0 : i32, i32
  }
  func.func @transform_3(%arg0: i32) -> (i32, i32) {
    %c0_i32 = arith.constant 0 : i32
    %c0_i32_0 = arith.constant 0 : i32
    %c0_i32_1 = arith.constant 0 : i32
    return %c0_i32, %c0_i32_0 : i32, i32
  }
  func.func @transform_4(%arg0: i32) -> (i32, i32) {
    %c0_i32 = arith.constant 0 : i32
    %c0_i32_0 = arith.constant 0 : i32
    %c0_i32_1 = arith.constant 0 : i32
    return %c0_i32, %c0_i32_0 : i32, i32
  }
  func.func @transform_5(%arg0: i32) -> (i32, i32) {
    %c0_i32 = arith.constant 0 : i32
    %c0_i32_0 = arith.constant 0 : i32
    %c0_i32_1 = arith.constant 0 : i32
    return %c0_i32, %c0_i32_0 : i32, i32
  }
  func.func @transform_6(%arg0: i32) -> (i32, i32) {
    %c0_i32 = arith.constant 0 : i32
    %c0_i32_0 = arith.constant 0 : i32
    %c0_i32_1 = arith.constant 0 : i32
    return %c0_i32, %c0_i32_0 : i32, i32
  }
  func.func @transform_7(%arg0: i32) -> (i32, i32) {
    %c0_i32 = arith.constant 0 : i32
    %c0_i32_0 = arith.constant 0 : i32
    %c0_i32_1 = arith.constant 0 : i32
    return %c0_i32, %c0_i32_0 : i32, i32
  }
}

</mosaic_0001>

<bundles_post_ra>
// kernel: tpu_custom_call.1
= control target key start
LH: loop header
LB: loop body
LE: loop exit
PB: predicated region body
PF: predicated region fallthrough
CT: control target
= control target key end

     0   :  { %12 = vsyncpa [#allocation4], 0  ;;  %s852_s0 = inlined_call_operand.hbm [shape: f32[16,128], index: 0, kind: input, shape index: {}]   ;;  %s853_s1 = inlined_call_operand.hbm [shape: s32[1,128], index: 1, kind: input, shape index: {}]   ;;  %s854_s2 = inlined_call_operand.vmem [shape: s32[1,128], index: 2, kind: input, shape index: {}]   ;;  %s855_s3 = inlined_call_operand.vmem [shape: f32[1,128], index: 3, kind: input, shape index: {}]   ;;  %s856_s4 = inlined_call_operand.hbm [shape: f32[128,128], index: 4, kind: input, shape index: {}]   ;;  %s857_s5 = inlined_call_operand.vmem [shape: f32[1,128], index: 5, kind: input, shape index: {}]   ;;  %s858_s6 = inlined_call_operand.hbm [shape: f32[128,128], index: 6, kind: input, shape index: {}]   ;;  %s859_s7 = inlined_call_operand.hbm [shape: f32[128,128], index: 7, kind: output, shape index: {}]  }
   0x1   :  { %13 = vsyncpa [#allocation7], 0 }
   0x2   :  { %14 = vsyncpa [#allocation10], 0  ;;  %s34_s26 = sshll.u32 %s853_s1, 4  ;;  %s35_s26 = int_to_ptr.hbm [resolvable:$true] %s34_s26 }
   0x3   :  { %15 = vsyncpa [#allocation5], 0  ;;  %s753_s27 = smov [#allocation6]   ;;  %s20_s8 = sshll.u32 %s852_s0, 4  ;;  %s21_s8 = int_to_ptr.hbm [resolvable:$true] %s20_s8 }
   0x4   :  { %s36_s28 = sshll.u32 %s753_s27, 4  ;;  %s754_s9 = smov [#allocation3]   ;;  %s37_s28 = int_to_ptr.vmem [resolvable:$true] %s36_s28 }
   0x5   :  { %39 = dma.hbm_to_vmem [thread:$0]  %s35_s26, 16, %s37_s28, [#allocation7]  }
   0x6   :  { %s22_s10 = sshll.u32 %s754_s9, 4  ;;  %s755_s11 = smov 128   ;;  %s23_s10 = int_to_ptr.vmem [resolvable:$true] %s22_s10 }
   0x7   :  { %s756_s12 = smov 8   ;;  %s48_s14 = sshll.u32 %s856_s4, 4  ;;  %s49_s14 = int_to_ptr.hbm [resolvable:$true] %s48_s14 }
   0x8   :  { %28 = dma.hbm_to_vmem [thread:$0]  %s21_s8, 256, %s23_s10, [#allocation4], %s755_s11, %s755_s11, %s756_s12  }
   0x9   :  { %s757_s15 = smov [#allocation8]   ;;  %s63_s18 = sshll.u32 %s858_s6, 4  ;;  %s64_s18 = int_to_ptr.hbm [resolvable:$true] %s63_s18 }
   0xa   :  { %s50_s16 = sshll.u32 %s757_s15, 4  ;;  %s758_s19 = smov [#allocation9]   ;;  %s51_s16 = int_to_ptr.vmem [resolvable:$true] %s50_s16 }
   0xb   :  { %56 = dma.hbm_to_vmem [thread:$0]  %s49_s14, 2048, %s51_s16, [#allocation7], %s755_s11, %s755_s11, %s756_s12  }
   0xc   :  { %s65_s20 = sshll.u32 %s758_s19, 4  ;;  %s66_s20 = int_to_ptr.vmem [resolvable:$true] %s65_s20 }
   0xd   :  { %71 = dma.hbm_to_vmem [thread:$0]  %s64_s18, 2048, %s66_s20, [#allocation10], %s755_s11, %s755_s11, %s756_s12  }
   0xe   :  { %745 = dma.done.wait [#allocation4], 256  }
   0xf   :  { %746 = vsyncadd [#allocation4], 4294967040 }
  0x10   :  { %747 = dma.done.wait [#allocation7], 2064  }
  0x11   :  { %748 = vsyncadd [#allocation7], 4294965232 }
  0x12   :  { %749 = dma.done.wait [#allocation10], 2048  }
  0x13   :  { %750 = vsyncadd [#allocation10], 4294965248  ;;  %v109_v0 = vlaneseq  ;;  %v621_v3 = vld [vmem:[#allocation6] ss:$0 sm:$0xff]  ;;  %v622_v4 = vld [vmem:[%s854_s2] ss:$0 sm:$0xff] }
  0x14   :  { %v623_v5 = vld [vmem:[%s855_s3] ss:$0 sm:$0xff]  ;;  %v148_v6 = vld [vmem:[#allocation3 + $0x8] sm:$0xff]  ;;  %vm181_vm6 = vcmask 130048   ;;  %v358_v22 = vld [vmem:[#allocation8 + $0x60] sm:$0xff]  ;;  %s550_s26 = sshll.u32 %s859_s7, 4  ;;  %s551_s26 = int_to_ptr.hbm [resolvable:$true] %s550_s26 }
  0x15   :  { %v110_v1 = vshrl.u32 %v109_v0, 7  ;;  %v147_v7 = vld [vmem:[#allocation3] sm:$0xff]  ;;  %244 = vmatpush.msra.mxu0 %v148_v6  ;;  %v361_v18 = vld [vmem:[#allocation8 + $0x78] sm:$0xff]  ;;  %v354_v27 = vld [vmem:[#allocation8 + $0x40] sm:$0xff] }
  0x16   :  { %366 = vmatpush.msra.mxu1 %v361_v18  ;;  %581 = vmatpush.msra.mxu3 %v361_v18  ;;  %v360_v20 = vld [vmem:[#allocation8 + $0x70] sm:$0xff]  ;;  %v359_v21 = vld [vmem:[#allocation8 + $0x68] sm:$0xff]  ;;  %v357_v23 = vld [vmem:[#allocation8 + $0x58] sm:$0xff] }
  0x17   :  { %v111_v2 = vadd.s32 8, %v110_v1  ;;  %vm117_vm0 = vcmp.ge.s32.totalorder %v110_v1, %v621_v3  ;;  %vm121_vm1 = vcmp.lt.s32.totalorder %v110_v1, %v622_v4  ;;  %245 = vmatpush.msra.mxu0 %v147_v7  ;;  %v356_v25 = vld [vmem:[#allocation8 + $0x50] sm:$0xff]  ;;  %v355_v26 = vld [vmem:[#allocation8 + $0x48] sm:$0xff]  ;;  %v353_v28 = vld [vmem:[#allocation8 + $0x38] sm:$0xff] }
  0x18   :  { %vm123_vm2 = vmand %vm117_vm0, %vm121_vm1  ;;  %367 = vmatpush.msra.mxu1 %v360_v20  ;;  %582 = vmatpush.msra.mxu3 %v360_v20  ;;  %v352_v30 = vld [vmem:[#allocation8 + $0x30] sm:$0xff]  ;;  %v351_v31 = vld [vmem:[#allocation8 + $0x28] sm:$0xff] }
  0x19   :  { %v129_v8 = vsel %vm123_vm2, %v623_v5, 0.0  ;;  %vm118_vm3 = vcmp.ge.s32.totalorder %v111_v2, %v621_v3  ;;  %vm122_vm4 = vcmp.lt.s32.totalorder %v111_v2, %v622_v4  ;;  %v350_v32 = vld [vmem:[#allocation8 + $0x20] sm:$0xff]  ;;  %v349_v33 = vld [vmem:[#allocation8 + $0x18] sm:$0xff]  ;;  %v348_v35 = vld [vmem:[#allocation8 + $0x10] sm:$0xff] }
  0x1a   :  { %149 = vxpose.xlu0.b32.start [1/2] (short) %v129_v8, 128  ;;  %vm124_vm5 = vmand %vm118_vm3, %vm122_vm4  ;;  %368 = vmatpush.msra.mxu1 %v359_v21  ;;  %v347_v36 = vld [vmem:[#allocation8 + $0x8] sm:$0xff]  ;;  %v346_v37 = vld [vmem:[#allocation8] sm:$0xff] }
  0x1b   :  { %v130_v9 = vsel %vm124_vm5, %v623_v5, 0.0  ;;  %583 = vmatpush.msra.mxu3 %v359_v21  ;;  %v462_v51 = vld [vmem:[#allocation9 + $0x78] sm:$0xff]  ;;  %v461_v52 = vld [vmem:[#allocation9 + $0x70] sm:$0xff]  ;;  %v460_v53 = vld [vmem:[#allocation9 + $0x68] sm:$0xff] }
  0x1c   :  { %369 = vmatpush.msra.mxu1 %v358_v22  ;;  %463 = vmatpush.msra.mxu2 %v462_v51  ;;  %v459_v55 = vld [vmem:[#allocation9 + $0x60] sm:$0xff]  ;;  %v458_v56 = vld [vmem:[#allocation9 + $0x58] sm:$0xff]  ;;  %v457_v57 = vld [vmem:[#allocation9 + $0x50] sm:$0xff] }
  0x1d   :  { %584 = vmatpush.msra.mxu3 %v358_v22  ;;  %v456_v58 = vld [vmem:[#allocation9 + $0x48] sm:$0xff]  ;;  %v455_v60 = vld [vmem:[#allocation9 + $0x40] sm:$0xff]  ;;  %v454_v61 = vld [vmem:[#allocation9 + $0x38] sm:$0xff] }
  0x1e   :  { %370 = vmatpush.msra.mxu1 %v357_v23  ;;  %464 = vmatpush.msra.mxu2 %v461_v52  ;;  %v453_v62 = vld [vmem:[#allocation9 + $0x30] sm:$0xff]  ;;  %v452_v63 = vld [vmem:[#allocation9 + $0x28] sm:$0xff]  ;;  %v451_v1 = vld [vmem:[#allocation9 + $0x20] sm:$0xff] }
  0x1f   :  { %585 = vmatpush.msra.mxu3 %v357_v23  ;;  %v450_v2 = vld [vmem:[#allocation9 + $0x18] sm:$0xff]  ;;  %v449_v3 = vld [vmem:[#allocation9 + $0x10] sm:$0xff]  ;;  %v448_v4 = vld [vmem:[#allocation9 + $0x8] sm:$0xff] }
  0x20   :  { %371 = vmatpush.msra.mxu1 %v356_v25  ;;  %465 = vmatpush.msra.mxu2 %v460_v53  ;;  %v447_v6 = vld [vmem:[#allocation9] sm:$0xff] }
  0x21   :  { %586 = vmatpush.msra.mxu3 %v356_v25 }
  0x22   :  { %150 = vxpose.xlu0.b32.end [2/2] (short) %v130_v9, 128  ;;  %372 = vmatpush.msra.mxu1 %v355_v26 }
  0x23   :  { %587 = vmatpush.msra.mxu3 %v355_v26  ;;  %466 = vmatpush.msra.mxu2 %v459_v55 }
  0x24   :  { %373 = vmatpush.msra.mxu1 %v354_v27 }
  0x25   :  { %588 = vmatpush.msra.mxu3 %v354_v27  ;;  %467 = vmatpush.msra.mxu2 %v458_v56 }
  0x26   :  { %374 = vmatpush.msra.mxu1 %v353_v28 }
  0x27   :  { %589 = vmatpush.msra.mxu3 %v353_v28  ;;  %468 = vmatpush.msra.mxu2 %v457_v57 }
  0x28   :  { %375 = vmatpush.msra.mxu1 %v352_v30 }
  0x29   :  { %590 = vmatpush.msra.mxu3 %v352_v30  ;;  %469 = vmatpush.msra.mxu2 %v456_v58 }
  0x2a   :  { %376 = vmatpush.msra.mxu1 %v351_v31 }
  0x2b   :  { %591 = vmatpush.msra.mxu3 %v351_v31  ;;  %470 = vmatpush.msra.mxu2 %v455_v60 }
  0x2c   :  { %377 = vmatpush.msra.mxu1 %v350_v32 }
  0x2d   :  { %592 = vmatpush.msra.mxu3 %v350_v32  ;;  %471 = vmatpush.msra.mxu2 %v454_v61 }
  0x2e   :  { %378 = vmatpush.msra.mxu1 %v349_v33 }
  0x2f   :  { %593 = vmatpush.msra.mxu3 %v349_v33  ;;  %472 = vmatpush.msra.mxu2 %v453_v62 }
  0x30   :  { %379 = vmatpush.msra.mxu1 %v348_v35 }
  0x31   :  { %594 = vmatpush.msra.mxu3 %v348_v35  ;;  %473 = vmatpush.msra.mxu2 %v452_v63 }
  0x32   :  { %380 = vmatpush.msra.mxu1 %v347_v36 }
  0x33   :  { %595 = vmatpush.msra.mxu3 %v347_v36  ;;  %474 = vmatpush.msra.mxu2 %v451_v1 }
  0x34   :  { %381 = vmatpush.msra.mxu1 %v346_v37 }
  0x35   :  { %596 = vmatpush.msra.mxu3 %v346_v37  ;;  %475 = vmatpush.msra.mxu2 %v450_v2 }
  0x37   :  { %597 = vmatpush.msrb.mxu3 %v462_v51  ;;  %476 = vmatpush.msra.mxu2 %v449_v3 }
  0x39   :  { %598 = vmatpush.msrb.mxu3 %v461_v52  ;;  %477 = vmatpush.msra.mxu2 %v448_v4 }
  0x3b   :  { %599 = vmatpush.msrb.mxu3 %v460_v53  ;;  %478 = vmatpush.msra.mxu2 %v447_v6 }
  0x3d   :  { %600 = vmatpush.msrb.mxu3 %v459_v55 }
  0x3f   :  { %601 = vmatpush.msrb.mxu3 %v458_v56 }
  0x41   :  { %602 = vmatpush.msrb.mxu3 %v457_v57 }
  0x43   :  { %603 = vmatpush.msrb.mxu3 %v456_v58 }
  0x45   :  { %604 = vmatpush.msrb.mxu3 %v455_v60 }
  0x47   :  { %605 = vmatpush.msrb.mxu3 %v454_v61 }
  0x49   :  { %606 = vmatpush.msrb.mxu3 %v453_v62 }
  0x4b   :  { %607 = vmatpush.msrb.mxu3 %v452_v63 }
  0x4d   :  { %608 = vmatpush.msrb.mxu3 %v451_v1 }
  0x4f   :  { %609 = vmatpush.msrb.mxu3 %v450_v2 }
  0x51   :  { %610 = vmatpush.msrb.mxu3 %v449_v3 }
  0x53   :  { %611 = vmatpush.msrb.mxu3 %v448_v4 }
  0x55   :  { %612 = vmatpush.msrb.mxu3 %v447_v6 }
  0xbe   :  { %v165_v10 = vpop.trf.xlu0 }
  0xbf   :  { %565 = vmatmul.msk.f32.vlgmr.msra.gmra.mxu0 %vm181_vm6, %v165_v10  ;;  %v624_v10 = vld [vmem:[%s857_s5] ss:$0 sm:$0xff]  ;;  %s759_s5 = smov [#allocation11]  }
  0xc0   :  { %s548_s23 = sshll.u32 %s759_s5, 4  ;;  %s549_s23 = int_to_ptr.vmem [resolvable:$true] %s548_s23 }
  0xc6   :  { %v166_v11 = vpop.trf.xlu0 }
  0xc7   :  { %566 = vmatmul.msk.f32.gmra.mxu0 %vm181_vm6, %v166_v11 }
  0xce   :  { %v167_v12 = vpop.trf.xlu0 }
  0xcf   :  { %567 = vmatmul.msk.f32.gmra.mxu0 %vm181_vm6, %v167_v12 }
  0xd6   :  { %v168_v13 = vpop.trf.xlu0 }
  0xd7   :  { %568 = vmatmul.msk.f32.gmra.mxu0 %vm181_vm6, %v168_v13 }
  0xde   :  { %v169_v14 = vpop.trf.xlu0 }
  0xdf   :  { %569 = vmatmul.msk.f32.gmra.mxu0 %vm181_vm6, %v169_v14 }
  0xe6   :  { %v170_v15 = vpop.trf.xlu0 }
  0xe7   :  { %570 = vmatmul.msk.f32.gmra.mxu0 %vm181_vm6, %v170_v15 }
  0xee   :  { %v171_v16 = vpop.trf.xlu0 }
  0xef   :  { %571 = vmatmul.msk.f32.gmra.mxu0 %vm181_vm6, %v171_v16 }
  0xf6   :  { %v172_v17 = vpop.trf.xlu0 }
  0xf7   :  { %572 = vmatmul.msk.f32.gmra.mxu0 %vm181_vm6, %v172_v17 }
  0xfe   :  { %v173_v19 = vpop.trf.xlu0 }
  0xff   :  { %573 = vmatmul.msk.f32.gmra.mxu0 %vm181_vm6, %v173_v19 }
 0x106   :  { %v174_v24 = vpop.trf.xlu0 }
 0x107   :  { %574 = vmatmul.msk.f32.gmra.mxu0 %vm181_vm6, %v174_v24 }
 0x10e   :  { %v175_v29 = vpop.trf.xlu0 }
 0x10f   :  { %575 = vmatmul.msk.f32.gmra.mxu0 %vm181_vm6, %v175_v29 }
 0x116   :  { %v176_v34 = vpop.trf.xlu0 }
 0x117   :  { %576 = vmatmul.msk.f32.gmra.mxu0 %vm181_vm6, %v176_v34 }
 0x11e   :  { %v177_v38 = vpop.trf.xlu0 }
 0x11f   :  { %577 = vmatmul.msk.f32.gmra.mxu0 %vm181_vm6, %v177_v38 }
 0x126   :  { %v178_v39 = vpop.trf.xlu0 }
 0x127   :  { %578 = vmatmul.msk.f32.gmra.mxu0 %vm181_vm6, %v178_v39 }
 0x12e   :  { %v179_v40 = vpop.trf.xlu0 }
 0x12f   :  { %579 = vmatmul.msk.f32.gmra.mxu0 %vm181_vm6, %v179_v40 }
 0x136   :  { %v180_v41 = vpop.trf.xlu0 }
 0x137   :  { %580 = vmatmul.msk.f32.gmra.mxu0 %vm181_vm6, %v180_v41 }
 0x13c   :  { %v247_v42 = vpop.f32.mrf.mxu0 }
 0x13d   :  { %382 = vmatmul.f32.vlgmr.msra.gmra.mxu1 %v247_v42 }
 0x144   :  { %v250_v43 = vpop.f32.mrf.mxu0 }
 0x145   :  { %385 = vmatmul.f32.gmra.mxu1 %v250_v43 }
 0x14c   :  { %v253_v44 = vpop.f32.mrf.mxu0 }
 0x14d   :  { %388 = vmatmul.f32.gmra.mxu1 %v253_v44 }
 0x154   :  { %v256_v45 = vpop.f32.mrf.mxu0 }
 0x155   :  { %391 = vmatmul.f32.gmra.mxu1 %v256_v45 }
 0x15c   :  { %v259_v46 = vpop.f32.mrf.mxu0 }
 0x15d   :  { %394 = vmatmul.f32.gmra.mxu1 %v259_v46 }
 0x164   :  { %v262_v47 = vpop.f32.mrf.mxu0 }
 0x165   :  { %397 = vmatmul.f32.gmra.mxu1 %v262_v47 }
 0x16c   :  { %v265_v48 = vpop.f32.mrf.mxu0 }
 0x16d   :  { %400 = vmatmul.f32.gmra.mxu1 %v265_v48 }
 0x174   :  { %v268_v49 = vpop.f32.mrf.mxu0 }
 0x175   :  { %403 = vmatmul.f32.gmra.mxu1 %v268_v49 }
 0x17c   :  { %v271_v50 = vpop.f32.mrf.mxu0 }
 0x17d   :  { %406 = vmatmul.f32.gmra.mxu1 %v271_v50 }
 0x184   :  { %v274_v54 = vpop.f32.mrf.mxu0 }
 0x185   :  { %409 = vmatmul.f32.gmra.mxu1 %v274_v54 }
 0x18c   :  { %v277_v59 = vpop.f32.mrf.mxu0 }
 0x18d   :  { %412 = vmatmul.f32.gmra.mxu1 %v277_v59 }
 0x194   :  { %v280_v0 = vpop.f32.mrf.mxu0 }
 0x195   :  { %415 = vmatmul.f32.gmra.mxu1 %v280_v0 }
 0x19c   :  { %v283_v5 = vpop.f32.mrf.mxu0 }
 0x19d   :  { %418 = vmatmul.f32.vlgmr.msra.gmra.mxu3 %v283_v5 }
 0x1a4   :  { %v286_v7 = vpop.f32.mrf.mxu0 }
 0x1a5   :  { %421 = vmatmul.f32.gmra.mxu3 %v286_v7 }
 0x1ac   :  { %v289_v8 = vpop.f32.mrf.mxu0 }
 0x1ad   :  { %424 = vmatmul.f32.gmra.mxu3 %v289_v8 }
 0x1b4   :  { %v292_v9 = vpop.f32.mrf.mxu0 }
 0x1b5   :  { %427 = vmatmul.f32.gmra.mxu3 %v292_v9 }
 0x1ba   :  { %v383_v11 = vpop.f32.mrf.mxu1 }
 0x1bb   :  { %v384_v12 = vadd.f32 %v624_v10, %v383_v11 }
 0x1bd   :  { %v431_v13 = vmax.f32 %v384_v12, 0.0 }
 0x1bf   :  { %479 = vmatmul.f32.vlgmr.msra.gmra.mxu2 %v431_v13 }
 0x1c2   :  { %v386_v14 = vpop.f32.mrf.mxu1 }
 0x1c3   :  { %v387_v15 = vadd.f32 %v624_v10, %v386_v14 }
 0x1c5   :  { %v432_v16 = vmax.f32 %v387_v15, 0.0 }
 0x1c7   :  { %482 = vmatmul.f32.gmra.mxu2 %v432_v16 }
 0x1ca   :  { %v389_v17 = vpop.f32.mrf.mxu1 }
 0x1cb   :  { %v390_v18 = vadd.f32 %v624_v10, %v389_v17 }
 0x1cd   :  { %v433_v19 = vmax.f32 %v390_v18, 0.0 }
 0x1cf   :  { %485 = vmatmul.f32.gmra.mxu2 %v433_v19 }
 0x1d2   :  { %v392_v20 = vpop.f32.mrf.mxu1 }
 0x1d3   :  { %v393_v21 = vadd.f32 %v624_v10, %v392_v20 }
 0x1d5   :  { %v434_v22 = vmax.f32 %v393_v21, 0.0 }
 0x1d7   :  { %488 = vmatmul.f32.gmra.mxu2 %v434_v22 }
 0x1da   :  { %v395_v23 = vpop.f32.mrf.mxu1 }
 0x1db   :  { %v396_v24 = vadd.f32 %v624_v10, %v395_v23 }
 0x1dd   :  { %v435_v25 = vmax.f32 %v396_v24, 0.0 }
 0x1df   :  { %491 = vmatmul.f32.gmra.mxu2 %v435_v25 }
 0x1e2   :  { %v398_v26 = vpop.f32.mrf.mxu1 }
 0x1e3   :  { %v399_v27 = vadd.f32 %v624_v10, %v398_v26 }
 0x1e5   :  { %v436_v28 = vmax.f32 %v399_v27, 0.0 }
 0x1e7   :  { %494 = vmatmul.f32.gmra.mxu2 %v436_v28 }
 0x1ea   :  { %v401_v29 = vpop.f32.mrf.mxu1 }
 0x1eb   :  { %v402_v30 = vadd.f32 %v624_v10, %v401_v29 }
 0x1ed   :  { %v437_v31 = vmax.f32 %v402_v30, 0.0 }
 0x1ef   :  { %497 = vmatmul.f32.gmra.mxu2 %v437_v31 }
 0x1f2   :  { %v404_v32 = vpop.f32.mrf.mxu1 }
 0x1f3   :  { %v405_v33 = vadd.f32 %v624_v10, %v404_v32 }
 0x1f5   :  { %v438_v34 = vmax.f32 %v405_v33, 0.0 }
 0x1f7   :  { %500 = vmatmul.f32.gmra.mxu2 %v438_v34 }
 0x1fa   :  { %v407_v35 = vpop.f32.mrf.mxu1 }
 0x1fb   :  { %v408_v36 = vadd.f32 %v624_v10, %v407_v35 }
 0x1fd   :  { %v439_v37 = vmax.f32 %v408_v36, 0.0 }
 0x1ff   :  { %503 = vmatmul.f32.gmra.mxu2 %v439_v37 }
 0x202   :  { %v410_v38 = vpop.f32.mrf.mxu1 }
 0x203   :  { %v411_v39 = vadd.f32 %v624_v10, %v410_v38 }
 0x205   :  { %v440_v40 = vmax.f32 %v411_v39, 0.0 }
 0x207   :  { %506 = vmatmul.f32.gmra.mxu2 %v440_v40 }
 0x20a   :  { %v413_v41 = vpop.f32.mrf.mxu1 }
 0x20b   :  { %v414_v42 = vadd.f32 %v624_v10, %v413_v41 }
 0x20d   :  { %v441_v43 = vmax.f32 %v414_v42, 0.0 }
 0x20f   :  { %509 = vmatmul.f32.gmra.mxu2 %v441_v43 }
 0x212   :  { %v416_v44 = vpop.f32.mrf.mxu1 }
 0x213   :  { %v417_v45 = vadd.f32 %v624_v10, %v416_v44 }
 0x215   :  { %v442_v46 = vmax.f32 %v417_v45, 0.0 }
 0x217   :  { %512 = vmatmul.f32.gmra.mxu2 %v442_v46 }
 0x220   :  { %v419_v47 = vpop.f32.mrf.mxu3 }
 0x221   :  { %v420_v48 = vadd.f32 %v624_v10, %v419_v47 }
 0x223   :  { %v443_v49 = vmax.f32 %v420_v48, 0.0 }
 0x225   :  { %515 = vmatmul.f32.vlgmr.msrb.gmra.mxu3 %v443_v49 }
 0x228   :  { %v422_v50 = vpop.f32.mrf.mxu3 }
 0x229   :  { %v423_v51 = vadd.f32 %v624_v10, %v422_v50 }
 0x22b   :  { %v444_v52 = vmax.f32 %v423_v51, 0.0 }
 0x22d   :  { %518 = vmatmul.f32.gmra.mxu3 %v444_v52 }
 0x230   :  { %v425_v53 = vpop.f32.mrf.mxu3 }
 0x231   :  { %v426_v54 = vadd.f32 %v624_v10, %v425_v53 }
 0x233   :  { %v445_v55 = vmax.f32 %v426_v54, 0.0 }
 0x235   :  { %521 = vmatmul.f32.gmra.mxu3 %v445_v55 }
 0x238   :  { %v428_v56 = vpop.f32.mrf.mxu3 }
 0x239   :  { %v429_v57 = vadd.f32 %v624_v10, %v428_v56 }
 0x23b   :  { %v446_v58 = vmax.f32 %v429_v57, 0.0 }
 0x23d   :  { %524 = vmatmul.f32.gmra.mxu3 %v446_v58 }
 0x242   :  { %v480_v59 = vpop.f32.mrf.mxu2 }
 0x243   :  { %528 = vst [vmem:[#allocation11] sm:$0xff] %v480_v59 }
 0x24a   :  { %v483_v60 = vpop.f32.mrf.mxu2 }
 0x24b   :  { %529 = vst [vmem:[#allocation11 + $0x8] sm:$0xff] %v483_v60 }
 0x252   :  { %v486_v61 = vpop.f32.mrf.mxu2 }
 0x253   :  { %530 = vst [vmem:[#allocation11 + $0x10] sm:$0xff] %v486_v61 }
 0x25a   :  { %v489_v62 = vpop.f32.mrf.mxu2 }
 0x25b   :  { %531 = vst [vmem:[#allocation11 + $0x18] sm:$0xff] %v489_v62 }
 0x262   :  { %v492_v63 = vpop.f32.mrf.mxu2 }
 0x263   :  { %532 = vst [vmem:[#allocation11 + $0x20] sm:$0xff] %v492_v63 }
 0x26a   :  { %v495_v0 = vpop.f32.mrf.mxu2 }
 0x26b   :  { %533 = vst [vmem:[#allocation11 + $0x28] sm:$0xff] %v495_v0 }
 0x272   :  { %v498_v1 = vpop.f32.mrf.mxu2 }
 0x273   :  { %534 = vst [vmem:[#allocation11 + $0x30] sm:$0xff] %v498_v1 }
 0x27a   :  { %v501_v2 = vpop.f32.mrf.mxu2 }
 0x27b   :  { %535 = vst [vmem:[#allocation11 + $0x38] sm:$0xff] %v501_v2 }
 0x282   :  { %v504_v3 = vpop.f32.mrf.mxu2 }
 0x283   :  { %536 = vst [vmem:[#allocation11 + $0x40] sm:$0xff] %v504_v3 }
 0x28a   :  { %v507_v4 = vpop.f32.mrf.mxu2 }
 0x28b   :  { %537 = vst [vmem:[#allocation11 + $0x48] sm:$0xff] %v507_v4 }
 0x292   :  { %v510_v5 = vpop.f32.mrf.mxu2 }
 0x293   :  { %538 = vst [vmem:[#allocation11 + $0x50] sm:$0xff] %v510_v5 }
 0x29a   :  { %v513_v6 = vpop.f32.mrf.mxu2 }
 0x29b   :  { %539 = vst [vmem:[#allocation11 + $0x58] sm:$0xff] %v513_v6 }
 0x2a8   :  { %v516_v7 = vpop.f32.mrf.mxu3 }
 0x2a9   :  { %540 = vst [vmem:[#allocation11 + $0x60] sm:$0xff] %v516_v7 }
 0x2b0   :  { %v519_v8 = vpop.f32.mrf.mxu3 }
 0x2b1   :  { %541 = vst [vmem:[#allocation11 + $0x68] sm:$0xff] %v519_v8 }
 0x2b8   :  { %v522_v9 = vpop.f32.mrf.mxu3 }
 0x2b9   :  { %542 = vst [vmem:[#allocation11 + $0x70] sm:$0xff] %v522_v9 }
 0x2c0   :  { %v525_v10 = vpop.f32.mrf.mxu3 }
 0x2c1   :  { %543 = vst [vmem:[#allocation11 + $0x78] sm:$0xff] %v525_v10 }
 0x2c2   :  { %556 = dma.vmem_to_hbm [thread:$0]  %s549_s23, 2048, %s551_s26, [#allocation5], %s755_s11, %s755_s11, %s756_s12  }
 0x2c3   :  { %751 = dma.done.wait [#allocation5], 2048  }
 0x2c4   :  { %752 = vsyncadd [#allocation5], 4294965248 }
 0x2c5   :  { %561 = vsyncpa [#allocation4], 1 }
 0x2c6   :  { %562 = vsyncpa [#allocation7], 1 }
 0x2c7   :  { %563 = vsyncpa [#allocation10], 1 }
 0x2c8   :  { %564 = vsyncpa [#allocation5], 1 }

</bundles_post_ra>
